<compile_context>
chip_gen: v7x
topology: tpu7x:2x2x1
jax: 0.10.0
libtpu: 0.0.40
codegen_flags: <defaults>
</compile_context>

<pallas_src>
import functools

import jax
import jax.numpy as jnp
from jax import lax
from jax.experimental import pallas as pl
from jax.experimental.pallas import tpu as pltpu


def _row_toeplitz(w_hwio, W):
    """HWIO (3,3,Cin,Cout) conv weights -> (W*Cin, 3*W*Cout) row-conv matrix.

    For each ky, column block [ky*W*Cout:(ky+1)*W*Cout] computes the 1-D
    (along W, SAME-padded) convolution of a (.., W*Cin) row with the ky-th
    kernel row: Y_ky[r, w*Cout+co] = sum_{kx,ci} x[r, w+kx-1, ci]*w[ky,kx,ci,co].
    """
    kh, kw, cin, cout = w_hwio.shape
    w_in = jnp.arange(W)[:, None]                     # (W, 1)
    w_out = jnp.arange(W)[None, :]                    # (1, W)
    kx = w_in - w_out + 1                             # (W, W)
    valid = (kx >= 0) & (kx < kw)
    g = w_hwio[:, jnp.clip(kx, 0, kw - 1)]            # (3, W, W, Cin, Cout)
    g = jnp.where(valid[None, :, :, None, None], g, jnp.zeros((), w_hwio.dtype))
    # rows indexed by (w_in, ci), cols by (ky, w_out, co)
    t = jnp.transpose(g, (1, 3, 0, 2, 4))             # (W, Cin, 3, W, Cout)
    return t.reshape(W * cin, kh * W * cout)


def _basic_block_kernel(x_ref, t1_ref, b1_ref, t2_ref, b2_ref, o_ref):
    """One batch tile per grid step.

    x_ref  : (B, H, W*Cin)        lane-packed input rows (f32)
    t1_ref : (W*Cin, 3*W*Cout)    block-Toeplitz weights of conv1 (mxu dtype)
    b1_ref : (1, W*Cout)          conv1 bias tiled along W (f32)
    t2_ref : (W*Cout, 3*W*Cout)   block-Toeplitz weights of conv2 (mxu dtype)
    b2_ref : (1, W*Cout)          conv2 bias tiled along W (f32)
    o_ref  : (B, H, W*Cout)
    """
    B, H, WCi = x_ref.shape
    WCo = o_ref.shape[2]
    BH = B * H
    mxu_dtype = t1_ref.dtype

    # Residual kept in f32; (B,H,WCi)->(BH,WCi) leading-dim collapse is free.
    x_f32 = x_ref[...].reshape(BH, WCi).astype(jnp.float32)

    # Hoisted border masks: one small (BH,1) iota/compare per grid step.
    h_of_row = lax.broadcasted_iota(jnp.int32, (BH, 1), 0) % H
    not_top = (h_of_row != 0).astype(jnp.float32)          # (BH, 1)
    not_bot = (h_of_row != H - 1).astype(jnp.float32)      # (BH, 1)

    def conv3x3(inp_mxu, t_ref, b_ref):
        # single MXU matmul: (BH, K) @ (K, 3*W*Cout), f32 accumulation.
        y = jnp.dot(inp_mxu, t_ref[...], preferred_element_type=jnp.float32)
        y0 = y[:, 0 * WCo:1 * WCo]   # ky=0 tap: contribution of row h-1
        y1 = y[:, 1 * WCo:2 * WCo]   # ky=1 tap: row h
        y2 = y[:, 2 * WCo:3 * WCo]   # ky=2 tap: contribution of row h+1
        # Sublane rolls (XLU slot) instead of concatenate copies; the wrapped
        # rows (image top/bottom, and cross-image rows in the batch stack) are
        # killed by the precomputed border masks.
        up = pltpu.roll(y2, shift=BH - 1, axis=0) * not_bot    # row r <- y2[r+1]
        down = pltpu.roll(y0, shift=1, axis=0) * not_top       # row r <- y0[r-1]
        return y1 + up + down + b_ref[...]

    mid = jnp.maximum(conv3x3(x_f32.astype(mxu_dtype), t1_ref, b1_ref), 0.0)
    out = jnp.maximum(conv3x3(mid.astype(mxu_dtype), t2_ref, b2_ref) + x_f32, 0.0)
    o_ref[...] = out.reshape(B, H, WCo).astype(o_ref.dtype)


def _pick_batch_tile(N, batch_tile):
    """Largest tile <= batch_tile giving >=2 grid steps (v7x: 2 TCs) and, when
    possible, dividing N exactly (no padded-batch compute)."""
    if N <= 1:
        return 1, 1
    cap = max(1, min(batch_tile, N // 2))
    bt = 1
    for cand in range(cap, 0, -1):
        if N % cand == 0:
            bt = cand
            break
    # Only a tiny exact divisor but large N: accept a little padding rather
    # than many under-filled grid steps.
    if bt < cap and N > 4 * cap:
        bt = cap
    n_tiles = -(-N // bt)
    return bt, n_tiles


def _vmem_limit_bytes(bt, H, W, Cin, Cout, mxu_itemsize):
    blk_in = bt * H * W * Cin * 4
    blk_out = bt * H * W * Cout * 4
    weights = (W * Cin + W * Cout) * (3 * W * Cout) * mxu_itemsize + 8 * W * Cout
    scratch = 4 * bt * H * 3 * W * Cout * 4          # matmul slabs etc. headroom
    need = 2 * (blk_in + blk_out) + 2 * weights + scratch
    # Raise above the conservative per-gen defaults (v5e default is 16 MiB) but
    # stay below v7x's 64 MiB physical VMEM.
    return int(min(60 * 1024 * 1024, max(32 * 1024 * 1024, 2 * need)))


def basic_block_no_batchnorm_packed(x_packed, t1, b1_row, t2, b2_row, *,
                                    H, W, Cin, Cout, batch_tile=None):
    """Fused block on lane-packed activations (N, H, W*Cin) -> (N, H, W*Cout).

    Use this entry point when the surrounding network keeps activations in the
    packed layout -- it avoids the NCHW<->NHWC HBM transposes entirely.
    """
    N = x_packed.shape[0]
    if batch_tile is None:
        batch_tile = max(1, 512 // H)     # ~512 MXU rows per step for larger N
    bt, n_tiles = _pick_batch_tile(N, batch_tile)
    n_pad = n_tiles * bt
    if n_pad != N:
        x_packed = jnp.pad(x_packed, ((0, n_pad - N), (0, 0), (0, 0)))

    # TODO(synk): for ResNet-scale W (e.g. W=56, C=64) the Toeplitz matrices no
    # longer fit VMEM (especially v7x's 64 MiB); tile their column (ky /
    # W-block) dimension via the t1/t2 BlockSpecs (single-buffered, since the
    # index_map is grid-invariant) and exploit the 3-band structure to skip the
    # structural zeros.
    out = pl.pallas_call(
        _basic_block_kernel,
        out_shape=jax.ShapeDtypeStruct((n_pad, H, W * Cout), x_packed.dtype),
        grid_spec=pltpu.PrefetchScalarGridSpec(
            num_scalar_prefetch=0,
            grid=(n_tiles,),
            in_specs=[
                pl.BlockSpec((bt, H, W * Cin), lambda n: (n, 0, 0)),
                pl.BlockSpec((W * Cin, 3 * W * Cout), lambda n: (0, 0)),
                pl.BlockSpec((1, W * Cout), lambda n: (0, 0)),
                pl.BlockSpec((W * Cout, 3 * W * Cout), lambda n: (0, 0)),
                pl.BlockSpec((1, W * Cout), lambda n: (0, 0)),
            ],
            out_specs=pl.BlockSpec((bt, H, W * Cout), lambda n: (n, 0, 0)),
        ),
        compiler_params=pltpu.CompilerParams(
            dimension_semantics=("parallel",),
            vmem_limit_bytes=_vmem_limit_bytes(
                bt, H, W, Cin, Cout, jnp.dtype(t1.dtype).itemsize),
        ),
    )(x_packed, t1, b1_row, t2, b2_row)
    return out[:N] if n_pad != N else out


def basic_block_no_batchnorm(x_nchw, w1, b1, w2, b2, *, batch_tile=None,
                             mxu_dtype=jnp.bfloat16):
    """Forward pass of BasicBlockNoBatchNorm (stride=1, downsample=None).

    x_nchw : (N, Cin, H, W) -- PyTorch NCHW interface
    w1, w2 : (3, 3, Cin, Cout) HWIO weights;  b1, b2 : (Cout,) biases
    mxu_dtype: dtype of the MXU operands (bf16 = native-rate MXU on all gens
               and half the weight DMA; f32 = exact path). Accumulation,
               biases and the residual add are always f32.
    """
    # TODO(synk): stride>1 / downsample paths of the module are not implemented
    # (module defaults stride=1, downsample=None only).
    N, Cin, H, W = x_nchw.shape
    Cout = w1.shape[-1]
    assert Cin == Cout, "stride=1 / downsample=None requires inplanes == planes"

    t1 = _row_toeplitz(w1, W).astype(mxu_dtype)       # (W*Cin,  3*W*Cout)
    t2 = _row_toeplitz(w2, W).astype(mxu_dtype)       # (W*Cout, 3*W*Cout)
    b1_row = jnp.tile(b1, W).reshape(1, W * Cout).astype(jnp.float32)
    b2_row = jnp.tile(b2, W).reshape(1, W * Cout).astype(jnp.float32)

    # NCHW -> lane-packed (N, H, W*C).  NOTE: these two boundary transposes are
    # the dominant HBM cost of this op in isolation; in a full network keep
    # activations packed and call basic_block_no_batchnorm_packed directly.
    x = jnp.transpose(x_nchw, (0, 2, 3, 1)).reshape(N, H, W * Cin)
    out = basic_block_no_batchnorm_packed(
        x, t1, b1_row, t2, b2_row, H=H, W=W, Cin=Cin, Cout=Cout,
        batch_tile=batch_tile)
    out = out.reshape(N, H, W, Cout)
    return jnp.transpose(out, (0, 3, 1, 2))           # NHWC -> NCHW


def _kaiming_normal_hwio(key, cin, cout):
    # PyTorch kaiming_normal_ default: gain=sqrt(2), mode=fan_in,
    # fan_in = cin * kh * kw.
    fan_in = cin * 3 * 3
    std = (2.0 / fan_in) ** 0.5
    return jax.random.normal(key, (3, 3, cin, cout), dtype=jnp.float32) * std


def _reference(x_nchw, w1, b1, w2, b2):
    """Pure-JAX reference using lax.conv (mirrors the PyTorch forward)."""
    x = jnp.transpose(x_nchw, (0, 2, 3, 1))
    dn = ("NHWC", "HWIO", "NHWC")
    out = lax.conv_general_dilated(x, w1, (1, 1), "SAME", dimension_numbers=dn)
    out = jax.nn.relu(out + b1)
    out = lax.conv_general_dilated(out, w2, (1, 1), "SAME", dimension_numbers=dn)
    out = out + b2
    out = jax.nn.relu(out + x)
    return jnp.transpose(out, (0, 3, 1, 2))


if __name__ == "__main__":
    key = jax.random.PRNGKey(0)
    k_x, k_w1, k_w2, k_b1, k_b2 = jax.random.split(key, 5)

    N, C, H, W = 2, 8, 16, 16   # inplanes = planes = 8, stride = 1; W*C = 128
    x = jax.random.normal(k_x, (N, C, H, W), dtype=jnp.float32)

    w1 = _kaiming_normal_hwio(k_w1, C, C)
    w2 = _kaiming_normal_hwio(k_w2, C, C)
    # module init zeroes the biases; use small non-zero biases here so the
    # bias path is actually exercised against the reference.
    b1 = 0.1 * jax.random.normal(k_b1, (C,), dtype=jnp.float32)
    b2 = 0.1 * jax.random.normal(k_b2, (C,), dtype=jnp.float32)

    ref = jax.block_until_ready(_reference(x, w1, b1, w2, b2))

    # Exact path (f32 MXU operands): verifies Toeplitz / roll / mask logic.
    fwd_f32 = jax.jit(functools.partial(basic_block_no_batchnorm,
                                        mxu_dtype=jnp.float32))
    out_f32 = jax.block_until_ready(fwd_f32(x, w1, b1, w2, b2))
    assert out_f32.shape == (N, C, H, W)
    assert jnp.allclose(out_f32, ref, atol=1e-3, rtol=1e-3), "f32 path mismatch"

    # Default fast path (bf16 MXU operands, f32 accumulation) per perf review;
    # looser tolerance accounts for bf16 rounding of matmul operands.
    fwd_bf16 = jax.jit(functools.partial(basic_block_no_batchnorm,
                                         mxu_dtype=jnp.bfloat16))
    out = jax.block_until_ready(fwd_bf16(x, w1, b1, w2, b2))
    assert out.shape == (N, C, H, W)
    assert jnp.allclose(out, ref, atol=3e-2, rtol=3e-2), "bf16 path mismatch"

    print("KERNEL_OK")
</pallas_src>

<mosaic_0001>
module attributes {stable_mosaic.version = 11 : i64} {
  func.func @_basic_block_kernel(%arg0: i32, %arg1: memref<1x16x128xf32, #tpu.memory_space<vmem>>, %arg2: memref<128x384xf32, #tpu.memory_space<vmem>>, %arg3: memref<1x128xf32, #tpu.memory_space<vmem>>, %arg4: memref<128x384xf32, #tpu.memory_space<vmem>>, %arg5: memref<1x128xf32, #tpu.memory_space<vmem>>, %arg6: memref<1x16x128xf32, #tpu.memory_space<vmem>>) attributes {dimension_semantics = [#tpu.dimension_semantics<parallel>], iteration_bounds = array<i64: 2>, scalar_prefetch = 0 : i64, scratch_operands = 0 : i64, tpu.core_type = #tpu.core_type<tc>, window_params = [{transform_indices = @transform_0, window_bounds = array<i64: 1, 16, 128>}, {pipeline_mode = #tpu.pipeline_mode<synchronous>, transform_indices = @transform_1, window_bounds = array<i64: 128, 384>}, {pipeline_mode = #tpu.pipeline_mode<synchronous>, transform_indices = @transform_2, window_bounds = array<i64: 1, 128>}, {pipeline_mode = #tpu.pipeline_mode<synchronous>, transform_indices = @transform_3, window_bounds = array<i64: 128, 384>}, {pipeline_mode = #tpu.pipeline_mode<synchronous>, transform_indices = @transform_4, window_bounds = array<i64: 1, 128>}, {transform_indices = @transform_5, window_bounds = array<i64: 1, 16, 128>}]} {
    %c0 = arith.constant 0 : index
    %c0_0 = arith.constant 0 : index
    %c0_1 = arith.constant 0 : index
    %0 = vector.load %arg1[%c0, %c0_0, %c0_1] : memref<1x16x128xf32, #tpu.memory_space<vmem>>, vector<1x16x128xf32>
    %1 = vector.shape_cast %0 : vector<1x16x128xf32> to vector<16x128xf32>
    %2 = tpu.iota {dimensions = array<i32: 0>} : vector<16x1xi32>
    %c16_i32 = arith.constant 16 : i32
    %c0_i32 = arith.constant 0 : i32
    %3 = arith.cmpi eq, %c16_i32, %c0_i32 : i32
    %c1_i32 = arith.constant 1 : i32
    %4 = arith.select %3, %c1_i32, %c16_i32 : i32
    %5 = vector.broadcast %4 : i32 to vector<16x1xi32>
    %6 = arith.remsi %2, %5 : vector<16x1xi32>
    %c0_i32_2 = arith.constant 0 : i32
    %7 = vector.broadcast %c0_i32_2 : i32 to vector<16x1xi32>
    %8 = arith.cmpi ne, %6, %7 : vector<16x1xi32>
    %c0_i32_3 = arith.constant 0 : i32
    %9 = vector.broadcast %c0_i32_3 : i32 to vector<16x1xi32>
    %10 = arith.cmpi slt, %6, %9 : vector<16x1xi32>
    %c0_i32_4 = arith.constant 0 : i32
    %11 = arith.cmpi slt, %4, %c0_i32_4 : i32
    %12 = vector.broadcast %11 : i1 to vector<16x1xi1>
    %13 = vector.broadcast %12 : vector<16x1xi1> to vector<16x1xi1>
    %14 = arith.xori %10, %13 : vector<16x1xi1>
    %15 = arith.andi %14, %8 : vector<16x1xi1>
    %16 = vector.broadcast %4 : i32 to vector<16x1xi32>
    %17 = arith.addi %6, %16 : vector<16x1xi32>
    %18 = arith.select %15, %17, %6 : vector<16x1xi1>, vector<16x1xi32>
    %c0_i32_5 = arith.constant 0 : i32
    %19 = vector.broadcast %c0_i32_5 : i32 to vector<16x1xi32>
    %20 = arith.cmpi ne, %18, %19 : vector<16x1xi32>
    %21 = arith.extui %20 : vector<16x1xi1> to vector<16x1xi32>
    %22 = arith.sitofp %21 : vector<16x1xi32> to vector<16x1xf32>
    %c15_i32 = arith.constant 15 : i32
    %23 = vector.broadcast %c15_i32 : i32 to vector<16x1xi32>
    %24 = arith.cmpi ne, %18, %23 : vector<16x1xi32>
    %25 = arith.extui %24 : vector<16x1xi1> to vector<16x1xi32>
    %26 = arith.sitofp %25 : vector<16x1xi32> to vector<16x1xf32>
    %c0_6 = arith.constant 0 : index
    %c0_7 = arith.constant 0 : index
    %27 = vector.load %arg2[%c0_6, %c0_7] : memref<128x384xf32, #tpu.memory_space<vmem>>, vector<128x384xf32>
    %cst = arith.constant dense<0.000000e+00> : vector<16x384xf32>
    %28 = tpu.matmul %1, %27, %cst {dimension_numbers = #tpu.dot_dimension_numbers<[1], [0], [0], [1], [0, 0, 1, 1], [], []>} : vector<16x128xf32>, vector<128x384xf32>, vector<16x384xf32> -> vector<16x384xf32>
    %29 = vector.extract_strided_slice %28 {offsets = [0, 0], sizes = [16, 128], strides = [1, 1]} : vector<16x384xf32> to vector<16x128xf32>
    %30 = vector.extract_strided_slice %28 {offsets = [0, 128], sizes = [16, 128], strides = [1, 1]} : vector<16x384xf32> to vector<16x128xf32>
    %31 = vector.extract_strided_slice %28 {offsets = [0, 256], sizes = [16, 128], strides = [1, 1]} : vector<16x384xf32> to vector<16x128xf32>
    %c15_i32_8 = arith.constant 15 : i32
    %32 = tpu.dynamic_rotate %31 by %c15_i32_8 dim 0 : vector<16x128xf32>, i32 -> vector<16x128xf32>
    %33 = vector.broadcast %26 : vector<16x1xf32> to vector<16x128xf32>
    %34 = arith.mulf %32, %33 : vector<16x128xf32>
    %c1_i32_9 = arith.constant 1 : i32
    %35 = tpu.dynamic_rotate %29 by %c1_i32_9 dim 0 : vector<16x128xf32>, i32 -> vector<16x128xf32>
    %36 = vector.broadcast %22 : vector<16x1xf32> to vector<16x128xf32>
    %37 = arith.mulf %35, %36 : vector<16x128xf32>
    %38 = arith.addf %30, %34 : vector<16x128xf32>
    %39 = arith.addf %38, %37 : vector<16x128xf32>
    %c0_10 = arith.constant 0 : index
    %c0_11 = arith.constant 0 : index
    %40 = vector.load %arg3[%c0_10, %c0_11] : memref<1x128xf32, #tpu.memory_space<vmem>>, vector<1x128xf32>
    %41 = vector.broadcast %40 : vector<1x128xf32> to vector<16x128xf32>
    %42 = arith.addf %39, %41 : vector<16x128xf32>
    %cst_12 = arith.constant 0.000000e+00 : f32
    %43 = vector.broadcast %cst_12 : f32 to vector<16x128xf32>
    %44 = arith.maximumf %42, %43 : vector<16x128xf32>
    %c0_13 = arith.constant 0 : index
    %c0_14 = arith.constant 0 : index
    %45 = vector.load %arg4[%c0_13, %c0_14] : memref<128x384xf32, #tpu.memory_space<vmem>>, vector<128x384xf32>
    %cst_15 = arith.constant dense<0.000000e+00> : vector<16x384xf32>
    %46 = tpu.matmul %44, %45, %cst_15 {dimension_numbers = #tpu.dot_dimension_numbers<[1], [0], [0], [1], [0, 0, 1, 1], [], []>} : vector<16x128xf32>, vector<128x384xf32>, vector<16x384xf32> -> vector<16x384xf32>
    %47 = vector.extract_strided_slice %46 {offsets = [0, 0], sizes = [16, 128], strides = [1, 1]} : vector<16x384xf32> to vector<16x128xf32>
    %48 = vector.extract_strided_slice %46 {offsets = [0, 128], sizes = [16, 128], strides = [1, 1]} : vector<16x384xf32> to vector<16x128xf32>
    %49 = vector.extract_strided_slice %46 {offsets = [0, 256], sizes = [16, 128], strides = [1, 1]} : vector<16x384xf32> to vector<16x128xf32>
    %c15_i32_16 = arith.constant 15 : i32
    %50 = tpu.dynamic_rotate %49 by %c15_i32_16 dim 0 : vector<16x128xf32>, i32 -> vector<16x128xf32>
    %51 = vector.broadcast %26 : vector<16x1xf32> to vector<16x128xf32>
    %52 = arith.mulf %50, %51 : vector<16x128xf32>
    %c1_i32_17 = arith.constant 1 : i32
    %53 = tpu.dynamic_rotate %47 by %c1_i32_17 dim 0 : vector<16x128xf32>, i32 -> vector<16x128xf32>
    %54 = vector.broadcast %22 : vector<16x1xf32> to vector<16x128xf32>
    %55 = arith.mulf %53, %54 : vector<16x128xf32>
    %56 = arith.addf %48, %52 : vector<16x128xf32>
    %57 = arith.addf %56, %55 : vector<16x128xf32>
    %c0_18 = arith.constant 0 : index
    %c0_19 = arith.constant 0 : index
    %58 = vector.load %arg5[%c0_18, %c0_19] : memref<1x128xf32, #tpu.memory_space<vmem>>, vector<1x128xf32>
    %59 = vector.broadcast %58 : vector<1x128xf32> to vector<16x128xf32>
    %60 = arith.addf %57, %59 : vector<16x128xf32>
    %61 = arith.addf %60, %1 : vector<16x128xf32>
    %cst_20 = arith.constant 0.000000e+00 : f32
    %62 = vector.broadcast %cst_20 : f32 to vector<16x128xf32>
    %63 = arith.maximumf %61, %62 : vector<16x128xf32>
    %64 = vector.shape_cast %63 : vector<16x128xf32> to vector<1x16x128xf32>
    %c0_21 = arith.constant 0 : index
    %c0_22 = arith.constant 0 : index
    %c0_23 = arith.constant 0 : index
    %65 = vector.load %arg6[%c0_21, %c0_22, %c0_23] : memref<1x16x128xf32, #tpu.memory_space<vmem>>, vector<1x16x128xf32>
    tpu.vector_store %arg6[%c0_21, %c0_22, %c0_23], %64 {strides = array<i32>} : memref<1x16x128xf32, #tpu.memory_space<vmem>>, vector<1x16x128xf32>,
    return
  }
  func.func @transform_0(%arg0: i32) -> (i32, i32, i32) {
    %c0_i32 = arith.constant 0 : i32
    %c0_i32_0 = arith.constant 0 : i32
    %c0_i32_1 = arith.constant 0 : i32
    return %arg0, %c0_i32, %c0_i32_0 : i32, i32, i32
  }
  func.func @transform_1(%arg0: i32) -> (i32, i32) {
    %c0_i32 = arith.constant 0 : i32
    %c0_i32_0 = arith.constant 0 : i32
    %c0_i32_1 = arith.constant 0 : i32
    return %c0_i32, %c0_i32_0 : i32, i32
  }
  func.func @transform_2(%arg0: i32) -> (i32, i32) {
    %c0_i32 = arith.constant 0 : i32
    %c0_i32_0 = arith.constant 0 : i32
    %c0_i32_1 = arith.constant 0 : i32
    return %c0_i32, %c0_i32_0 : i32, i32
  }
  func.func @transform_3(%arg0: i32) -> (i32, i32) {
    %c0_i32 = arith.constant 0 : i32
    %c0_i32_0 = arith.constant 0 : i32
    %c0_i32_1 = arith.constant 0 : i32
    return %c0_i32, %c0_i32_0 : i32, i32
  }
  func.func @transform_4(%arg0: i32) -> (i32, i32) {
    %c0_i32 = arith.constant 0 : i32
    %c0_i32_0 = arith.constant 0 : i32
    %c0_i32_1 = arith.constant 0 : i32
    return %c0_i32, %c0_i32_0 : i32, i32
  }
  func.func @transform_5(%arg0: i32) -> (i32, i32, i32) {
    %c0_i32 = arith.constant 0 : i32
    %c0_i32_0 = arith.constant 0 : i32
    %c0_i32_1 = arith.constant 0 : i32
    return %arg0, %c0_i32, %c0_i32_0 : i32, i32, i32
  }
}

</mosaic_0001>

<bundles_post_ra>
// kernel: tile.13
= control target key start
LH: loop header
LB: loop body
LE: loop exit
PB: predicated region body
PF: predicated region fallthrough
CT: control target
= control target key end

     0   :  { %s28_s0 = inlined_call_operand.vmem [shape: f32[8], index: 0, kind: input, shape index: {}]   ;;  %s29_s1 = inlined_call_operand.vmem [shape: f32[16,8], index: 1, kind: output, shape index: {}]  }
   0x1   :  { %v4_v0 = vld [vmem:[%s28_s0] ss:$0 sm:$0xff] }
   0x2   :  { %5 = vst [vmem:[%s29_s1] sm:$0xff] %v4_v0  ;;  %8 = vst [vmem:[%s29_s1 + $0x8] sm:$0xff] %v4_v0 }

// kernel: tile.14
= control target key start
LH: loop header
LB: loop body
LE: loop exit
PB: predicated region body
PF: predicated region fallthrough
CT: control target
= control target key end

     0   :  { %s131_s10 = smov 120   ;;  %s132_s11 = smov 104   ;;  %vm3_vm0 = vcmask 64512   ;;  %vm9_vm1 = vcmask 1048512   ;;  %vm15_vm2 = vcmask 982912   ;;  %vm21_vm3 = vcmask 917312   ;;  %s207_s0 = inlined_call_operand.vmem [shape: f32[16,8], index: 0, kind: input, shape index: {}]   ;;  %s208_s1 = inlined_call_operand.vmem [shape: f32[1,128], index: 1, kind: output, shape index: {}]  }
   0x1   :  { %v101_v0 = vld [vmem:[%s207_s0 + $0xf] sm:$0x1]   ;;  %v103_v1 = vld [vmem:[%s207_s0 + $0xd] sm:$0x1]   ;;  %v102_v2 = vld [vmem:[%s207_s0 + $0xe] sm:$0x1]  }
   0x2   :  { %7 = vrot.lane.b32.xlu0 %v101_v0, %s131_s10  ;;  %19 = vrot.lane.b32.xlu1 %v103_v1, %s132_s11  ;;  %v104_v3 = vld [vmem:[%s207_s0 + $0xc] sm:$0x1]   ;;  %s133_s16 = smov 112   ;;  %s134_s17 = smov 96   ;;  %v105_v4 = vld [vmem:[%s207_s0 + $0xb] sm:$0x1]  }
   0x3   :  { %v106_v5 = vld [vmem:[%s207_s0 + $0xa] sm:$0x1]   ;;  %v2_v6 = vld [vmem:[%s207_s0] sm:$0x1]   ;;  %s135_s24 = smov 88   ;;  %s136_s25 = smov 80  }
   0x4   :  { %4 = vst.msk [vmem:[#allocation0] sm:$0x1] %vm3_vm0, %v2_v6   ;;  %v107_v7 = vld [vmem:[%s207_s0 + $0x9] sm:$0x1]   ;;  %v108_v8 = vld [vmem:[%s207_s0 + $0x8] sm:$0x1]  }
   0x5   :  { %s137_s30 = smov 72   ;;  %s138_s2 = smov 64   ;;  %v109_v9 = vld [vmem:[%s207_s0 + $0x7] sm:$0x1]   ;;  %v110_v10 = vld [vmem:[%s207_s0 + $0x6] sm:$0x1]  }
   0x6   :  { %13 = vrot.lane.b32.xlu0 %v102_v2, %s133_s16  ;;  %25 = vrot.lane.b32.xlu1 %v104_v3, %s134_s17  ;;  %s139_s7 = smov 56   ;;  %s140_s8 = smov 48   ;;  %v111_v11 = vld [vmem:[%s207_s0 + $0x5] sm:$0x1]   ;;  %v112_v12 = vld [vmem:[%s207_s0 + $0x4] sm:$0x1]  }
   0x7   :  { %s141_s13 = smov 40   ;;  %s142_s14 = smov 32   ;;  %v113_v13 = vld [vmem:[%s207_s0 + $0x3] sm:$0x1]   ;;  %v114_v14 = vld [vmem:[%s207_s0 + $0x2] sm:$0x1]  }
   0x8   :  { %s143_s19 = smov 24   ;;  %s144_s20 = smov 16   ;;  %v115_v15 = vld [vmem:[%s207_s0 + $0x1] sm:$0x1]   ;;  %vm27_vm4 = vcmask 851712   ;;  %vm33_vm5 = vcmask 786112  }
   0x9   :  { %s145_s0 = smov 8   ;;  %vm39_vm6 = vcmask 720512   ;;  %vm45_vm7 = vcmask 654912   ;;  %vm51_vm8 = vcmask 589312   ;;  %vm57_vm9 = vcmask 523712  }
   0xa   :  { %31 = vrot.lane.b32.xlu0 %v105_v4, %s135_s24  ;;  %37 = vrot.lane.b32.xlu1 %v106_v5, %s136_s25  ;;  %vm63_vm10 = vcmask 458112   ;;  %vm69_vm11 = vcmask 392512   ;;  %vm75_vm12 = vcmask 326912   ;;  %vm81_vm13 = vcmask 261312  }
   0xb   :  { %vm87_vm14 = vcmask 195712   ;;  %vm93_vm15 = vcmask 130112  }
   0xe   :  { %43 = vrot.lane.b32.xlu0 %v107_v7, %s137_s30  ;;  %49 = vrot.lane.b32.xlu1 %v108_v8, %s138_s2 }
  0x12   :  { %55 = vrot.lane.b32.xlu0 %v109_v9, %s139_s7  ;;  %61 = vrot.lane.b32.xlu1 %v110_v10, %s140_s8 }
  0x16   :  { %67 = vrot.lane.b32.xlu0 %v111_v11, %s141_s13  ;;  %73 = vrot.lane.b32.xlu1 %v112_v12, %s142_s14 }
  0x1a   :  { %79 = vrot.lane.b32.xlu0 %v113_v13, %s143_s19  ;;  %85 = vrot.lane.b32.xlu1 %v114_v14, %s144_s20 }
  0x1e   :  { %91 = vrot.lane.b32.xlu0 %v115_v15, %s145_s0 }
  0x74   :  { %v8_v16 = vpop.permute.xlu0 %7   ;;  %v20_v17 = vpop.permute.xlu1 %19  }
  0x75   :  { %10 = vst.msk [vmem:[#allocation0] sm:$0x1] %vm9_vm1, %v8_v16  }
  0x78   :  { %v14_v18 = vpop.permute.xlu0 %13   ;;  %v26_v19 = vpop.permute.xlu1 %25  }
  0x79   :  { %16 = vst.msk [vmem:[#allocation0] sm:$0x1] %vm15_vm2, %v14_v18  }
  0x7a   :  { %22 = vst.msk [vmem:[#allocation0] sm:$0x1] %vm21_vm3, %v20_v17  }
  0x7b   :  { %28 = vst.msk [vmem:[#allocation0] sm:$0x1] %vm27_vm4, %v26_v19  }
  0x7c   :  { %v32_v20 = vpop.permute.xlu0 %31   ;;  %v38_v21 = vpop.permute.xlu1 %37  }
  0x7d   :  { %34 = vst.msk [vmem:[#allocation0] sm:$0x1] %vm33_vm5, %v32_v20  }
  0x7e   :  { %40 = vst.msk [vmem:[#allocation0] sm:$0x1] %vm39_vm6, %v38_v21  }
  0x80   :  { %v44_v22 = vpop.permute.xlu0 %43   ;;  %v50_v23 = vpop.permute.xlu1 %49  }
  0x81   :  { %46 = vst.msk [vmem:[#allocation0] sm:$0x1] %vm45_vm7, %v44_v22  }
  0x82   :  { %52 = vst.msk [vmem:[#allocation0] sm:$0x1] %vm51_vm8, %v50_v23  }
  0x84   :  { %v56_v24 = vpop.permute.xlu0 %55   ;;  %v62_v25 = vpop.permute.xlu1 %61  }
  0x85   :  { %58 = vst.msk [vmem:[#allocation0] sm:$0x1] %vm57_vm9, %v56_v24  }
  0x86   :  { %64 = vst.msk [vmem:[#allocation0] sm:$0x1] %vm63_vm10, %v62_v25  }
  0x88   :  { %v68_v26 = vpop.permute.xlu0 %67   ;;  %v74_v27 = vpop.permute.xlu1 %73  }
  0x89   :  { %70 = vst.msk [vmem:[#allocation0] sm:$0x1] %vm69_vm11, %v68_v26  }
  0x8a   :  { %76 = vst.msk [vmem:[#allocation0] sm:$0x1] %vm75_vm12, %v74_v27  }
  0x8c   :  { %v80_v28 = vpop.permute.xlu0 %79   ;;  %v86_v29 = vpop.permute.xlu1 %85  }
  0x8d   :  { %82 = vst.msk [vmem:[#allocation0] sm:$0x1] %vm81_vm13, %v80_v28  }
  0x8e   :  { %88 = vst.msk [vmem:[#allocation0] sm:$0x1] %vm87_vm14, %v86_v29  }
  0x90   :  { %v92_v30 = vpop.permute.xlu0 %91  }
  0x91   :  { %94 = vst.msk [vmem:[#allocation0] sm:$0x1] %vm93_vm15, %v92_v30  }
  0x98   :  { %v98_v31 = vld [vmem:[#allocation0] sm:$0x1] }
  0x99   :  { %100 = vst [vmem:[%s208_s1] sm:$0x1] %v98_v31 }

// kernel: basic_block_no_batchnorm.1
= control target key start
LH: loop header
LB: loop body
LE: loop exit
PB: predicated region body
PF: predicated region fallthrough
CT: control target
= control target key end

     0   :  { %s1080_s18 = smov 0   ;;  %s1436_s0 = inlined_call_operand.vmem [shape: f32[2,16,128], index: 0, kind: input, shape index: {}]   ;;  %s1437_s1 = inlined_call_operand.vmem [shape: f32[128,384], index: 1, kind: input, shape index: {}]   ;;  %s1438_s2 = inlined_call_operand.vmem [shape: f32[1,128], index: 2, kind: input, shape index: {}]   ;;  %s1439_s3 = inlined_call_operand.vmem [shape: f32[128,384], index: 3, kind: input, shape index: {}]   ;;  %s1440_s4 = inlined_call_operand.vmem [shape: f32[1,128], index: 4, kind: input, shape index: {}]   ;;  %s1441_s5 = inlined_call_operand.vmem [shape: f32[2,16,128], index: 5, kind: output, shape index: {}]  }
   0x1 LB: > { %s781_s19 = sadd.s32 4294967295, %s1047_s18   ;;  %p785_p0 = scmp.ge.s32.totalorder %s1047_s18, 1  ;;  %s1047_s18 = sphi %s1080_s18, %s15_s18  }
   0x2   : > { %p187_p1 = scmp.lt.s32.totalorder %s1047_s18, 3 }
   0x4   : > { %p188_p2 = pnand %p785_p0, %p187_p1 }
   0x5   : > { %v267_v0 = vld [vmem:[%s1437_s1 + $0x8] sm:$0xff] (!%p188_p2)  ;;  %v270_v1 = vld [vmem:[%s1437_s1 + $0x20] sm:$0xff] (!%p188_p2)  ;;  %v268_v2 = vld [vmem:[%s1437_s1 + $0x10] sm:$0xff] (!%p188_p2)  ;;  %v1049_v7 = vmov (!%p188_p2), 0.0   ;;  %p1118_p3 = scmp.lt.s32.totalorder (!%p188_p2), %s781_s19, 1 }
   0x6   : > { %191 = sbr.rel (%p188_p2) target bundleno = 497 (0x1f1), region = 40  ;;  %v904_v3 = vpack.c.bf16 (!%p188_p2), %v270_v1, %v267_v0  ;;  %v271_v4 = vld [vmem:[%s1437_s1 + $0x28] sm:$0xff] (!%p188_p2)  ;;  %v266_v5 = vld [vmem:[%s1437_s1] sm:$0xff] (!%p188_p2)  ;;  %v269_v6 = vld [vmem:[%s1437_s1 + $0x18] sm:$0xff] (!%p188_p2)  ;;  %378 = vmatprep.mubr.f32.mxu0 (!%p188_p2), %v1049_v7 }
   0x7   : > { %v936_v8 = vpack.c.bf16 (!%p188_p2), %v271_v4, %v268_v2  ;;  %v906_v9 = vpack.c.bf16 (!%p188_p2), %v269_v6, %v266_v5  ;;  %v273_v10 = vld [vmem:[%s1437_s1 + $0x38] sm:$0xff] (!%p188_p2)  ;;  %v276_v11 = vld [vmem:[%s1437_s1 + $0x50] sm:$0xff] (!%p188_p2)  ;;  %v274_v12 = vld [vmem:[%s1437_s1 + $0x40] sm:$0xff] (!%p188_p2) }
   0x8   : > { %905 = vmatprep.subr.bf16.mxu0 (!%p188_p2), %v904_v3  ;;  %v908_v13 = vpack.c.bf16 (!%p188_p2), %v276_v11, %v273_v10  ;;  %v277_v14 = vld [vmem:[%s1437_s1 + $0x58] sm:$0xff] (!%p188_p2)  ;;  %v272_v15 = vld [vmem:[%s1437_s1 + $0x30] sm:$0xff] (!%p188_p2)  ;;  %v275_v16 = vld [vmem:[%s1437_s1 + $0x48] sm:$0xff] (!%p188_p2) }
   0x9   : > { %937 = vmatprep.subr.bf16.mxu1 (!%p188_p2), %v936_v8  ;;  %907 = vmatpush1.bf16.msra.mxu0 (!%p188_p2), %v906_v9  ;;  %v940_v17 = vpack.c.bf16 (!%p188_p2), %v277_v14, %v274_v12  ;;  %v910_v18 = vpack.c.bf16 (!%p188_p2), %v275_v16, %v272_v15  ;;  %v279_v19 = vld [vmem:[%s1437_s1 + $0x68] sm:$0xff] (!%p188_p2)  ;;  %v282_v20 = vld [vmem:[%s1437_s1 + $0x80] sm:$0xff] (!%p188_p2)  ;;  %v280_v21 = vld [vmem:[%s1437_s1 + $0x70] sm:$0xff] (!%p188_p2) }
   0xa   : > { %939 = vmatpush3.bf16.msra.mxu1 (!%p188_p2), %v936_v8  ;;  %909 = vmatprep.subr.bf16.mxu0 (!%p188_p2), %v908_v13  ;;  %v912_v22 = vpack.c.bf16 (!%p188_p2), %v282_v20, %v279_v19  ;;  %v283_v23 = vld [vmem:[%s1437_s1 + $0x88] sm:$0xff] (!%p188_p2)  ;;  %v278_v24 = vld [vmem:[%s1437_s1 + $0x60] sm:$0xff] (!%p188_p2)  ;;  %v281_v25 = vld [vmem:[%s1437_s1 + $0x78] sm:$0xff] (!%p188_p2) }
   0xb   : > { %941 = vmatprep.subr.bf16.mxu1 (!%p188_p2), %v940_v17  ;;  %v944_v26 = vpack.c.bf16 (!%p188_p2), %v283_v23, %v280_v21  ;;  %v285_v27 = vld [vmem:[%s1437_s1 + $0x98] sm:$0xff] (!%p188_p2)  ;;  %v288_v28 = vld [vmem:[%s1437_s1 + $0xb0] sm:$0xff] (!%p188_p2)  ;;  %v286_v29 = vld [vmem:[%s1437_s1 + $0xa0] sm:$0xff] (!%p188_p2)  ;;  %v914_v31 = vpack.c.bf16 (!%p188_p2), %v281_v25, %v278_v24 }
   0xc   : > { %v289_v30 = vld [vmem:[%s1437_s1 + $0xb8] sm:$0xff] (!%p188_p2)  ;;  %v916_v32 = vpack.c.bf16 (!%p188_p2), %v288_v28, %v285_v27  ;;  %v284_v33 = vld [vmem:[%s1437_s1 + $0x90] sm:$0xff] (!%p188_p2)  ;;  %v287_v34 = vld [vmem:[%s1437_s1 + $0xa8] sm:$0xff] (!%p188_p2) }
   0xd   : > { %s1444_s19 = smov (!%p1118_p3, %s781_s19), 1  ;;  %911 = vmatpush1.bf16.msra.mxu0 %v910_v18  ;;  %v948_v35 = vpack.c.bf16 %v289_v30, %v286_v29  ;;  %v291_v36 = vld [vmem:[%s1437_s1 + $0xc8] sm:$0xff]  ;;  %v294_v37 = vld [vmem:[%s1437_s1 + $0xe0] sm:$0xff]  ;;  %v292_v38 = vld [vmem:[%s1437_s1 + $0xd0] sm:$0xff]  ;;  %v918_v40 = vpack.c.bf16 %v287_v34, %v284_v33 }
   0xe   : > { %943 = vmatpush3.bf16.msra.mxu1 %v940_v17  ;;  %913 = vmatprep.subr.bf16.mxu0 %v912_v22  ;;  %s796_s27 = sshll.u32 %s1444_s19, 4  ;;  %v295_v39 = vld [vmem:[%s1437_s1 + $0xe8] sm:$0xff]  ;;  %v920_v41 = vpack.c.bf16 %v294_v37, %v291_v36  ;;  %v290_v42 = vld [vmem:[%s1437_s1 + $0xc0] sm:$0xff]  ;;  %v293_v43 = vld [vmem:[%s1437_s1 + $0xd8] sm:$0xff] }
   0xf   : > { %945 = vmatprep.subr.bf16.mxu1 %v944_v26  ;;  %s1197_s14 = scalar_lea.vmem %s1436_s0, %s796_s27  ;;  %v952_v44 = vpack.c.bf16 %v295_v39, %v292_v38  ;;  %v297_v45 = vld [vmem:[%s1437_s1 + $0xf8] sm:$0xff]  ;;  %v300_v46 = vld [vmem:[%s1437_s1 + $0x110] sm:$0xff]  ;;  %v298_v47 = vld [vmem:[%s1437_s1 + $0x100] sm:$0xff]  ;;  %v922_v49 = vpack.c.bf16 %v293_v43, %v290_v42  ;;  %s224_s24 = scalar_lea.vmem %s1441_s5, %s796_s27 }
  0x10   : > { %v301_v48 = vld [vmem:[%s1437_s1 + $0x118] sm:$0xff]  ;;  %v1212_v50 = vld [vmem:[%s1197_s14] sm:$0xff]  ;;  %v924_v51 = vpack.c.bf16 %v300_v46, %v297_v45  ;;  %v296_v52 = vld [vmem:[%s1437_s1 + $0xf0] sm:$0xff] }
  0x11   : > { %915 = vmatpush1.bf16.msra.mxu0 %v914_v31  ;;  %v299_v53 = vld [vmem:[%s1437_s1 + $0x108] sm:$0xff]  ;;  %v956_v54 = vpack.c.bf16 %v301_v48, %v298_v47  ;;  %v306_v56 = vld [vmem:[%s1437_s1 + $0x140] sm:$0xff]  ;;  %866 = vmatprep.mubr.f32.mxu1 %v1212_v50  ;;  %v304_v57 = vld [vmem:[%s1437_s1 + $0x130] sm:$0xff] }
  0x12   : > { %947 = vmatpush3.bf16.msra.mxu1 %v944_v26  ;;  %917 = vmatprep.subr.bf16.mxu0 %v916_v32  ;;  %v303_v55 = vld [vmem:[%s1437_s1 + $0x128] sm:$0xff]  ;;  %v926_v59 = vpack.c.bf16 %v299_v53, %v296_v52  ;;  %v302_v61 = vld [vmem:[%s1437_s1 + $0x120] sm:$0xff]  ;;  %v305_v62 = vld [vmem:[%s1437_s1 + $0x138] sm:$0xff] }
  0x13   : > { %949 = vmatprep.subr.bf16.mxu1 %v948_v35  ;;  %v307_v58 = vld [vmem:[%s1437_s1 + $0x148] sm:$0xff]  ;;  %v928_v60 = vpack.c.bf16 %v306_v56, %v303_v55  ;;  %v309_v0 = vld [vmem:[%s1437_s1 + $0x158] sm:$0xff]  ;;  %v312_v1 = vld [vmem:[%s1437_s1 + $0x170] sm:$0xff]  ;;  %v930_v4 = vpack.c.bf16 %v305_v62, %v302_v61 }
  0x14   : > { %v960_v63 = vpack.c.bf16 %v307_v58, %v304_v57  ;;  %v310_v2 = vld [vmem:[%s1437_s1 + $0x160] sm:$0xff]  ;;  %v313_v3 = vld [vmem:[%s1437_s1 + $0x178] sm:$0xff]  ;;  %v932_v5 = vpack.c.bf16 %v312_v1, %v309_v0  ;;  %v308_v6 = vld [vmem:[%s1437_s1 + $0x150] sm:$0xff] }
  0x15   : > { %919 = vmatpush1.bf16.msra.mxu0 %v918_v40  ;;  %v311_v8 = vld [vmem:[%s1437_s1 + $0x168] sm:$0xff]  ;;  %v964_v9 = vpack.c.bf16 %v313_v3, %v310_v2  ;;  %v499_v11 = vld [vmem:[%s1439_s3 + $0x20] sm:$0xff]  ;;  %v497_v12 = vld [vmem:[%s1439_s3 + $0x10] sm:$0xff] }
  0x16   : > { %951 = vmatpush3.bf16.msra.mxu1 %v948_v35  ;;  %921 = vmatprep.subr.bf16.mxu0 %v920_v41  ;;  %v496_v10 = vld [vmem:[%s1439_s3 + $0x8] sm:$0xff]  ;;  %v934_v14 = vpack.c.bf16 %v311_v8, %v308_v6  ;;  %v495_v16 = vld [vmem:[%s1439_s3] sm:$0xff]  ;;  %v498_v17 = vld [vmem:[%s1439_s3 + $0x18] sm:$0xff] }
  0x17   : > { %953 = vmatprep.subr.bf16.mxu1 %v952_v44  ;;  %v500_v13 = vld [vmem:[%s1439_s3 + $0x28] sm:$0xff]  ;;  %v968_v15 = vpack.c.bf16 %v499_v11, %v496_v10  ;;  %v502_v19 = vld [vmem:[%s1439_s3 + $0x38] sm:$0xff]  ;;  %v505_v20 = vld [vmem:[%s1439_s3 + $0x50] sm:$0xff]  ;;  %v970_v24 = vpack.c.bf16 %v498_v17, %v495_v16 }
  0x18   : > { %v1000_v18 = vpack.c.bf16 %v500_v13, %v497_v12  ;;  %v503_v21 = vld [vmem:[%s1439_s3 + $0x40] sm:$0xff]  ;;  %v506_v22 = vld [vmem:[%s1439_s3 + $0x58] sm:$0xff]  ;;  %v1288_v23 = vld [vmem:[%s1197_s14 + $0x8] sm:$0xff]  ;;  %v972_v25 = vpack.c.bf16 %v505_v20, %v502_v19 }
  0x19   : > { %923 = vmatpush1.bf16.msra.mxu0 %v922_v49  ;;  %v501_v26 = vld [vmem:[%s1439_s3 + $0x30] sm:$0xff]  ;;  %v504_v27 = vld [vmem:[%s1439_s3 + $0x48] sm:$0xff]  ;;  %v1004_v28 = vpack.c.bf16 %v506_v22, %v503_v21  ;;  %v511_v30 = vld [vmem:[%s1439_s3 + $0x80] sm:$0xff]  ;;  %v227_v22 = vlaneseq }
  0x1a   : > { %955 = vmatpush3.bf16.msra.mxu1 %v952_v44  ;;  %925 = vmatprep.subr.bf16.mxu0 %v924_v51  ;;  %v508_v29 = vld [vmem:[%s1439_s3 + $0x68] sm:$0xff]  ;;  %v509_v31 = vld [vmem:[%s1439_s3 + $0x70] sm:$0xff]  ;;  %v974_v33 = vpack.c.bf16 %v504_v27, %v501_v26  ;;  %v507_v35 = vld [vmem:[%s1439_s3 + $0x60] sm:$0xff] }
  0x1b   : > { %957 = vmatprep.subr.bf16.mxu1 %v956_v54  ;;  %v512_v32 = vld [vmem:[%s1439_s3 + $0x88] sm:$0xff]  ;;  %v976_v34 = vpack.c.bf16 %v511_v30, %v508_v29  ;;  %v510_v36 = vld [vmem:[%s1439_s3 + $0x78] sm:$0xff]  ;;  %v517_v39 = vld [vmem:[%s1439_s3 + $0xb0] sm:$0xff] }
  0x1c   : > { %v1008_v37 = vpack.c.bf16 %v512_v32, %v509_v31  ;;  %v514_v38 = vld [vmem:[%s1439_s3 + $0x98] sm:$0xff]  ;;  %v515_v40 = vld [vmem:[%s1439_s3 + $0xa0] sm:$0xff]  ;;  %v978_v42 = vpack.c.bf16 %v510_v36, %v507_v35  ;;  %v513_v44 = vld [vmem:[%s1439_s3 + $0x90] sm:$0xff] }
  0x1d   : > { %927 = vmatpush1.bf16.msra.mxu0 %v926_v59  ;;  %v518_v41 = vld [vmem:[%s1439_s3 + $0xb8] sm:$0xff]  ;;  %v980_v43 = vpack.c.bf16 %v517_v39, %v514_v38  ;;  %v516_v45 = vld [vmem:[%s1439_s3 + $0xa8] sm:$0xff]  ;;  %v523_v49 = vld [vmem:[%s1439_s3 + $0xe0] sm:$0xff] }
  0x1e   : > { %959 = vmatpush3.bf16.msra.mxu1 %v956_v54  ;;  %929 = vmatprep.subr.bf16.mxu0 %v928_v60  ;;  %v1012_v46 = vpack.c.bf16 %v518_v41, %v515_v40  ;;  %v982_v47 = vpack.c.bf16 %v516_v45, %v513_v44  ;;  %v520_v48 = vld [vmem:[%s1439_s3 + $0xc8] sm:$0xff]  ;;  %v519_v52 = vld [vmem:[%s1439_s3 + $0xc0] sm:$0xff]  ;;  %v522_v53 = vld [vmem:[%s1439_s3 + $0xd8] sm:$0xff] }
  0x1f   : > { %961 = vmatprep.subr.bf16.mxu1 %v960_v63  ;;  %v984_v51 = vpack.c.bf16 %v523_v49, %v520_v48  ;;  %v521_v54 = vld [vmem:[%s1439_s3 + $0xd0] sm:$0xff]  ;;  %v986_v55 = vpack.c.bf16 %v522_v53, %v519_v52  ;;  %v524_v56 = vld [vmem:[%s1439_s3 + $0xe8] sm:$0xff]  ;;  %v526_v58 = vld [vmem:[%s1439_s3 + $0xf8] sm:$0xff] }
  0x20   : > { %v1016_v57 = vpack.c.bf16 %v524_v56, %v521_v54  ;;  %v529_v59 = vld [vmem:[%s1439_s3 + $0x110] sm:$0xff]  ;;  %v528_v62 = vld [vmem:[%s1439_s3 + $0x108] sm:$0xff]  ;;  %v530_v1 = vld [vmem:[%s1439_s3 + $0x118] sm:$0xff] }
  0x21   : > { %931 = vmatpush1.bf16.msra.mxu0 %v930_v4  ;;  %v988_v60 = vpack.c.bf16 %v529_v59, %v526_v58  ;;  %v525_v61 = vld [vmem:[%s1439_s3 + $0xf0] sm:$0xff]  ;;  %v532_v3 = vld [vmem:[%s1439_s3 + $0x128] sm:$0xff]  ;;  %v535_v4 = vld [vmem:[%s1439_s3 + $0x140] sm:$0xff] }
  0x22   : > { %963 = vmatpush3.bf16.msra.mxu1 %v960_v63  ;;  %933 = vmatprep.subr.bf16.mxu0 %v932_v5  ;;  %v527_v63 = vld [vmem:[%s1439_s3 + $0x100] sm:$0xff]  ;;  %v990_v0 = vpack.c.bf16 %v528_v62, %v525_v61  ;;  %v992_v5 = vpack.c.bf16 %v535_v4, %v532_v3  ;;  %v534_v8 = vld [vmem:[%s1439_s3 + $0x138] sm:$0xff]  ;;  %v536_v11 = vld [vmem:[%s1439_s3 + $0x148] sm:$0xff] }
  0x23   : > { %965 = vmatprep.subr.bf16.mxu1 %v964_v9  ;;  %v1020_v2 = vpack.c.bf16 %v530_v1, %v527_v63  ;;  %v531_v6 = vld [vmem:[%s1439_s3 + $0x120] sm:$0xff]  ;;  %v538_v13 = vld [vmem:[%s1439_s3 + $0x158] sm:$0xff]  ;;  %v537_v16 = vld [vmem:[%s1439_s3 + $0x150] sm:$0xff] }
  0x24   : > { %v994_v10 = vpack.c.bf16 %v534_v8, %v531_v6  ;;  %v540_v17 = vld [vmem:[%s1439_s3 + $0x168] sm:$0xff]  ;;  %v542_v20 = vld [vmem:[%s1439_s3 + $0x178] sm:$0xff]  ;;  %v792_v48 = vld [vmem:[%s1438_s2] ss:$0 sm:$0xff] }
  0x25   : > { %935 = vmatpush1.bf16.msra.mxu0 %v934_v14  ;;  %v541_v14 = vld [vmem:[%s1439_s3 + $0x170] sm:$0xff]  ;;  %v998_v19 = vpack.c.bf16 %v540_v17, %v537_v16 }
  0x26   : > { %967 = vmatpush3.bf16.msra.mxu1 %v964_v9  ;;  %969 = vmatprep.subr.bf16.mxu0 %v968_v15  ;;  %v533_v9 = vld [vmem:[%s1439_s3 + $0x130] sm:$0xff]  ;;  %v996_v15 = vpack.c.bf16 %v541_v14, %v538_v13 }
  0x27   : > { %1001 = vmatprep.subr.bf16.mxu1 %v1000_v18  ;;  %v1024_v12 = vpack.c.bf16 %v536_v11, %v533_v9 }
  0x28   : > { %379 = vmatmul.mubr.f32.vlgmr.msra.gmra.mrb[0].mxu0 %v1212_v50 }
  0x29   : > { %867 = vmatmul.mubr.f32.vlgmr.msra.gmra.mrb[0].mxu1 %v1288_v23  ;;  %384 = vmatprep.mubr.f32.mxu0 %v1049_v7 }
  0x2a   : > { %971 = vmatpush1.bf16.msra.mxu0 %v970_v24  ;;  %1003 = vmatpush3.bf16.msra.mxu1 %v1000_v18  ;;  %v539_v18 = vld [vmem:[%s1439_s3 + $0x160] sm:$0xff]  ;;  %v228_v24 = vshrl.u32 %v227_v22, 7 }
  0x2b   : > { %973 = vmatprep.subr.bf16.mxu0 %v972_v25  ;;  %1005 = vmatprep.subr.bf16.mxu1 %v1004_v28  ;;  %v1028_v21 = vpack.c.bf16 %v542_v20, %v539_v18 }
  0x2c   : > { %385 = vmatmul.mubr.f32.gmra.mrb[2].mxu0 %v1288_v23  ;;  %v229_v25 = vadd.s32 8, %v228_v24  ;;  %v234_v27 = vand.u32 15, %v228_v24  ;;  %vm468_vm2 = vcmp.lt.s32.totalorder %v228_v24, 7  ;;  %vm475_vm3 = vcmp.lt.s32.totalorder %v228_v24, 1 }
  0x2d   : > { %607 = vmatprep.mubr.f32.mxu0 %v1049_v7 }
  0x2e   : > { %975 = vmatpush1.bf16.msra.mxu0 %v974_v33  ;;  %1007 = vmatpush3.bf16.msra.mxu1 %v1004_v28  ;;  %v241_v26 = vand.u32 15, %v229_v25  ;;  %vm254_vm1 = vcmp.ne.s32.totalorder %v234_v27, 0 }
  0x2f   : > { %977 = vmatprep.subr.bf16.mxu0 %v976_v34  ;;  %1009 = vmatprep.subr.bf16.mxu1 %v1008_v37  ;;  %v790_v35 = vsel %vm254_vm1, 1.0, %v1049_v7 }
  0x30   : > { %vm261_vm0 = vcmp.ne.s32.totalorder %v241_v26, 15 }
  0x31   : > { %v791_v34 = vsel %vm261_vm0, 1.0, %v1049_v7 }
  0x32   : > { %979 = vmatpush1.bf16.msra.mxu0 %v978_v42  ;;  %1011 = vmatpush3.bf16.msra.mxu1 %v1008_v37 }
  0x33   : > { %981 = vmatprep.subr.bf16.mxu0 %v980_v43  ;;  %1013 = vmatprep.subr.bf16.mxu1 %v1012_v46 }
  0x36   : > { %983 = vmatpush1.bf16.msra.mxu0 %v982_v47  ;;  %1015 = vmatpush3.bf16.msra.mxu1 %v1012_v46 }
  0x37   : > { %985 = vmatprep.subr.bf16.mxu0 %v984_v51  ;;  %1017 = vmatprep.subr.bf16.mxu1 %v1016_v57 }
  0x3a   : > { %987 = vmatpush1.bf16.msra.mxu0 %v986_v55  ;;  %1019 = vmatpush3.bf16.msra.mxu1 %v1016_v57 }
  0x3b   : > { %989 = vmatprep.subr.bf16.mxu0 %v988_v60  ;;  %1021 = vmatprep.subr.bf16.mxu1 %v1020_v2 }
  0x3e   : > { %991 = vmatpush1.bf16.msra.mxu0 %v990_v0  ;;  %1023 = vmatpush3.bf16.msra.mxu1 %v1020_v2 }
  0x3f   : > { %993 = vmatprep.subr.bf16.mxu0 %v992_v5  ;;  %1025 = vmatprep.subr.bf16.mxu1 %v1024_v12 }
  0x42   : > { %995 = vmatpush1.bf16.msra.mxu0 %v994_v10  ;;  %1027 = vmatpush3.bf16.msra.mxu1 %v1024_v12  ;;  %v793_v10 = vld [vmem:[%s1440_s4] ss:$0 sm:$0xff] }
  0x43   : > { %997 = vmatprep.subr.bf16.mxu0 %v996_v15  ;;  %1029 = vmatprep.subr.bf16.mxu1 %v1028_v21 }
  0x46   : > { %999 = vmatpush1.bf16.msra.mxu0 %v998_v19  ;;  %1031 = vmatpush3.bf16.msra.mxu1 %v1028_v21 }
  0xfb   : > { %v380_v28 = vpop.f32.mrb[0].mxu0 }
  0xfc   : > { %v868_v29 = vpop.f32.mrb[0].mxu1  ;;  %v382_v30 = vpop.f32.mrb[1].mxu0  ;;  %v473_v37 = vrot.slane %v380_v28, 7 }
  0xfd   : > { %v467_v31 = vrot.slane %v868_v29, 1  ;;  %v457_v32 = vpop.f32.mrb[1].mxu1 }
  0xfe   : > { %v466_v33 = vrot.slane %v457_v32, 1 }
  0xff   : > { %v386_v36 = vpop.f32.mrb[2].mxu0 }
 0x100   : > { %v469_v38 = vsel %vm468_vm2, %v466_v33, %v467_v31  ;;  %v474_v39 = vrot.slane %v386_v36, 7  ;;  %v388_v40 = vpop.f32.mrb[3].mxu0  ;;  %v470_v41 = vsel %vm468_vm2, %v467_v31, %v466_v33 }
 0x101   : > { %v480_v42 = vadd.f32 %v469_v38, %v382_v30  ;;  %v472_v43 = vmul.f32 %v791_v34, %v470_v41 }
 0x102   : > { %v477_v44 = vsel %vm475_vm3, %v474_v39, %v473_v37  ;;  %v476_v45 = vsel %vm475_vm3, %v473_v37, %v474_v39 }
 0x103   : > { %v478_v46 = vmul.f32 %v790_v35, %v477_v44  ;;  %v481_v47 = vadd.f32 %v472_v43, %v388_v40 }
 0x105   : > { %v482_v49 = vadd.f32 %v480_v42, %v478_v46  ;;  %v483_v51 = vadd.f32 %v481_v47, %v476_v45 }
 0x107   : > { %v491_v52 = vadd.f32 %v792_v48, %v482_v49  ;;  %v492_v53 = vadd.f32 %v792_v48, %v483_v51 }
 0x109   : > { %v493_v54 = vmax.f32 %v491_v52, 0.0  ;;  %v494_v55 = vmax.f32 %v492_v53, 0.0 }
 0x10b   : > { %608 = vmatmul.mubr.f32.vlgmr.msra.gmra.mrb[4].mxu0 %v493_v54  ;;  %901 = vmatprep.mubr.f32.mxu1 %v493_v54 }
 0x10c   : > { %902 = vmatmul.mubr.f32.vlgmr.msra.gmra.mrb[2].mxu1 %v494_v55  ;;  %613 = vmatprep.mubr.f32.mxu0 %v1049_v7 }
 0x10f   : > { %614 = vmatmul.mubr.f32.gmra.mrb[6].mxu0 %v494_v55 }
 0x1de   : > { %v609_v56 = vpop.f32.mrb[4].mxu0 }
 0x1df   : > { %v611_v57 = vpop.f32.mrb[5].mxu0  ;;  %v903_v58 = vpop.f32.mrb[2].mxu1  ;;  %v701_v63 = vrot.slane %v609_v56, 7 }
 0x1e0   : > { %v696_v59 = vrot.slane %v903_v58, 1  ;;  %v686_v60 = vpop.f32.mrb[3].mxu1 }
 0x1e1   : > { %v695_v61 = vrot.slane %v686_v60, 1 }
 0x1e2   : > { %v615_v62 = vpop.f32.mrb[6].mxu0 }
 0x1e3   : > { %v697_v0 = vsel %vm468_vm2, %v695_v61, %v696_v59  ;;  %v702_v1 = vrot.slane %v615_v62, 7  ;;  %v617_v2 = vpop.f32.mrb[7].mxu0  ;;  %v698_v3 = vsel %vm468_vm2, %v696_v59, %v695_v61 }
 0x1e4   : > { %v707_v4 = vadd.f32 %v697_v0, %v611_v57  ;;  %v700_v5 = vmul.f32 %v791_v34, %v698_v3 }
 0x1e5   : > { %v704_v7 = vsel %vm475_vm3, %v702_v1, %v701_v63  ;;  %v703_v6 = vsel %vm475_vm3, %v701_v63, %v702_v1 }
 0x1e6   : > { %v705_v8 = vmul.f32 %v790_v35, %v704_v7  ;;  %v708_v9 = vadd.f32 %v700_v5, %v617_v2 }
 0x1e8   : > { %v709_v11 = vadd.f32 %v707_v4, %v705_v8  ;;  %v710_v12 = vadd.f32 %v708_v9, %v703_v6 }
 0x1ea   : > { %v718_v13 = vadd.f32 %v793_v10, %v709_v11  ;;  %v719_v14 = vadd.f32 %v793_v10, %v710_v12 }
 0x1ec   : > { %v720_v15 = vadd.f32 %v718_v13, %v1212_v50  ;;  %v721_v16 = vadd.f32 %v719_v14, %v1288_v23 }
 0x1ee   : > { %v722_v17 = vmax.f32 %v720_v15, 0.0  ;;  %v723_v18 = vmax.f32 %v721_v16, 0.0 }
 0x1f0   : > { %724 = vst [vmem:[%s224_s24] sm:$0xff] %v722_v17  ;;  %725 = vst [vmem:[%s224_s24 + $0x8] sm:$0xff] %v723_v18 }
 0x1f1 PF: > { %s15_s18 = sadd.s32 1, %s1047_s18  }
 0x1f2   : > { %p12_p4 = scmp.ge.s32.totalorder %s15_s18, 4  }
 0x1f4   :  { %14 = sbr.rel (!%p12_p4) target bundleno = 1 (0x1), region = 70 }

</bundles_post_ra>
